<compile_context>
chip_gen: v7x
topology: tpu7x:2x2x1
jax: 0.10.0
libtpu: 0.0.40
codegen_flags: <defaults>
</compile_context>

<pallas_src>
import math
import functools

import jax
import jax.numpy as jnp
from jax.experimental import pallas as pl
from jax.experimental.pallas import tpu as pltpu


def timestep_embedding(timesteps, dim, max_period=10000):
    """Sinusoidal timestep embedding, identical to the PyTorch reference."""
    half = dim // 2
    freqs = jnp.exp(
        -math.log(max_period) * jnp.arange(half, dtype=jnp.float32) / half
    )
    args = timesteps[:, None].astype(jnp.float32) * freqs[None, :]
    emb = jnp.concatenate([jnp.cos(args), jnp.sin(args)], axis=-1)
    if dim % 2:
        emb = jnp.concatenate([emb, jnp.zeros_like(emb[:, :1])], axis=-1)
    return emb


def _dnn_kernel(xin_ref, w1_ref, w2_ref, bias_ref, o_ref):
    """Fused 2-layer MLP tile: tanh(tanh(xin @ W1 + b1) @ W2 + b2)."""
    hidden = w1_ref.shape[1]
    out_dim = w2_ref.shape[1]
    bias = bias_ref[...]                 # [2, max(hidden,out)] slab, single DMA
    b1 = bias[0:1, :hidden]
    b2 = bias[1:2, :out_dim]
    # TODO(synk): nn.Dropout is identity here (eval-mode forward); training-mode
    # masking/scaling is not implemented. norm=True branch is also omitted
    # (module default is norm=False).
    h = jnp.tanh(
        jnp.dot(xin_ref[...], w1_ref[...], preferred_element_type=jnp.float32)
        + b1)
    o_ref[...] = jnp.tanh(
        jnp.dot(h, w2_ref[...], preferred_element_type=jnp.float32) + b2)


def pack_dnn_params(params, in_dim):
    """Fold emb_layer into fc1 and pack biases into one slab (done once)."""
    w1x = params["w1"][:in_dim, :]
    w1e = params["w1"][in_dim:, :]
    w1e_folded = params["w_emb"] @ w1e                      # [emb, hidden]
    b1_folded = params["b1"] + params["b_emb"] @ w1e        # [1, hidden]
    w1_fused = jnp.concatenate([w1x, w1e_folded], axis=0)   # [in+emb, hidden]
    hidden = w1_fused.shape[1]
    out_dim = params["w2"].shape[1]
    width = max(hidden, out_dim)
    bias = jnp.zeros((2, width), jnp.float32)
    bias = bias.at[0, :hidden].set(b1_folded[0])
    bias = bias.at[1, :out_dim].set(params["b2"][0])
    return {"w1": w1_fused, "w2": params["w2"], "bias": bias}


@functools.partial(jax.jit, static_argnames=("emb_size", "block_b"))
def dnn_forward(x, timesteps, packed, emb_size, *, block_b=2048):
    """Wrapper: timestep embedding + concat (glue), then the fused kernel."""
    temb = timestep_embedding(timesteps, emb_size)
    xin = jnp.concatenate([x.astype(jnp.float32), temb], axis=-1)  # [B, in+emb]
    B, in_f = xin.shape
    w1, w2, bias = packed["w1"], packed["w2"], packed["bias"]
    hidden, out_dim = w1.shape[1], w2.shape[1]

    # Batch tile: full extent for small B (no padding needed); otherwise
    # block_b rows (multiple of 8 -> sublane aligned).
    if B <= block_b:
        tb, n_blocks, Bp = B, 1, B
    else:
        tb = block_b
        n_blocks = pl.cdiv(B, tb)
        Bp = n_blocks * tb
    if Bp != B:
        xin = jnp.pad(xin, ((0, Bp - B), (0, 0)))

    out = pl.pallas_call(
        _dnn_kernel,
        out_shape=jax.ShapeDtypeStruct((Bp, out_dim), jnp.float32),
        grid_spec=pltpu.PrefetchScalarGridSpec(
            num_scalar_prefetch=0,
            grid=(n_blocks,),
            in_specs=[
                pl.BlockSpec((tb, in_f), lambda i: (i, 0)),        # x_in tile
                pl.BlockSpec((in_f, hidden), lambda i: (0, 0)),    # W1 resident
                pl.BlockSpec((hidden, out_dim), lambda i: (0, 0)), # W2 resident
                pl.BlockSpec(bias.shape, lambda i: (0, 0)),        # bias slab
            ],
            out_specs=pl.BlockSpec((tb, out_dim), lambda i: (i, 0)),
        ),
        compiler_params=pltpu.CompilerParams(
            dimension_semantics=("parallel",)),
    )(xin, w1, w2, bias)
    return out[:B]


def _xavier_normal(key, fan_in, fan_out):
    std = math.sqrt(2.0 / (fan_in + fan_out))
    return std * jax.random.normal(key, (fan_in, fan_out), dtype=jnp.float32)


def init_dnn_params(key, in_dim, out_dim, emb_size):
    """Xavier-normal weights / zero biases (mirrors the PyTorch init)."""
    in_dims_temp = in_dim + emb_size
    hidden = int(in_dims_temp / 2)
    k_emb, k1, k2 = jax.random.split(key, 3)
    return {
        "w_emb": _xavier_normal(k_emb, emb_size, emb_size),
        "b_emb": jnp.zeros((1, emb_size), jnp.float32),
        "w1": _xavier_normal(k1, in_dims_temp, hidden),
        "b1": jnp.zeros((1, hidden), jnp.float32),
        "w2": _xavier_normal(k2, hidden, out_dim),
        "b2": jnp.zeros((1, out_dim), jnp.float32),
    }


def dnn_reference(x, timesteps, params, emb_size):
    """Pure-JAX reference matching the original (un-folded) module."""
    temb = timestep_embedding(timesteps, emb_size)
    emb = temb @ params["w_emb"] + params["b_emb"]
    h = jnp.concatenate([x, emb], axis=-1)
    h = jnp.tanh(h @ params["w1"] + params["b1"])
    h = jnp.tanh(h @ params["w2"] + params["b2"])
    return h


if __name__ == "__main__":
    # Shapes consistent with the module: DNN(in_dim=24, out_dim=24, emb_size=8)
    B, IN_DIM, OUT_DIM, EMB = 4, 24, 24, 8

    key = jax.random.PRNGKey(0)
    k_params, k_x, k_t, k_x2, k_t2 = jax.random.split(key, 5)

    params = init_dnn_params(k_params, IN_DIM, OUT_DIM, EMB)
    packed = pack_dnn_params(params, IN_DIM)

    # --- small batch (single full-extent block, no padding) ---
    x = jax.random.normal(k_x, (B, IN_DIM), dtype=jnp.float32)
    timesteps = jax.random.randint(k_t, (B,), 0, 1000).astype(jnp.float32)

    out = jax.block_until_ready(dnn_forward(x, timesteps, packed, EMB))
    ref = dnn_reference(x, timesteps, params, EMB)
    assert out.shape == (B, OUT_DIM)
    assert jnp.allclose(out, ref, atol=1e-4, rtol=1e-4), "kernel mismatch (B=4)"

    # --- exercise the batch-grid + padding path (still small) ---
    B2 = 20
    x2 = jax.random.normal(k_x2, (B2, IN_DIM), dtype=jnp.float32)
    t2 = jax.random.randint(k_t2, (B2,), 0, 1000).astype(jnp.float32)
    out2 = jax.block_until_ready(dnn_forward(x2, t2, packed, EMB, block_b=8))
    ref2 = dnn_reference(x2, t2, params, EMB)
    assert out2.shape == (B2, OUT_DIM)
    assert jnp.allclose(out2, ref2, atol=1e-4, rtol=1e-4), "kernel mismatch (B=20)"

    print("KERNEL_OK")
</pallas_src>

<mosaic_0001>
module attributes {stable_mosaic.version = 11 : i64} {
  func.func @_dnn_kernel(%arg0: i32, %arg1: memref<4x32xf32, #tpu.memory_space<vmem>>, %arg2: memref<32x16xf32, #tpu.memory_space<vmem>>, %arg3: memref<16x24xf32, #tpu.memory_space<vmem>>, %arg4: memref<2x24xf32, #tpu.memory_space<vmem>>, %arg5: memref<4x24xf32, #tpu.memory_space<vmem>>) attributes {dimension_semantics = [#tpu.dimension_semantics<parallel>], iteration_bounds = array<i64: 1>, scalar_prefetch = 0 : i64, scratch_operands = 0 : i64, tpu.core_type = #tpu.core_type<tc>, window_params = [{transform_indices = @transform_0, window_bounds = array<i64: 4, 32>}, {pipeline_mode = #tpu.pipeline_mode<synchronous>, transform_indices = @transform_1, window_bounds = array<i64: 32, 16>}, {pipeline_mode = #tpu.pipeline_mode<synchronous>, transform_indices = @transform_2, window_bounds = array<i64: 16, 24>}, {pipeline_mode = #tpu.pipeline_mode<synchronous>, transform_indices = @transform_3, window_bounds = array<i64: 2, 24>}, {transform_indices = @transform_4, window_bounds = array<i64: 4, 24>}]} {
    %c0 = arith.constant 0 : index
    %c0_0 = arith.constant 0 : index
    %0 = vector.load %arg4[%c0, %c0_0] : memref<2x24xf32, #tpu.memory_space<vmem>>, vector<2x24xf32>
    %1 = vector.extract_strided_slice %0 {offsets = [0, 0], sizes = [1, 16], strides = [1, 1]} : vector<2x24xf32> to vector<1x16xf32>
    %2 = vector.extract_strided_slice %0 {offsets = [1, 0], sizes = [1, 24], strides = [1, 1]} : vector<2x24xf32> to vector<1x24xf32>
    %c0_1 = arith.constant 0 : index
    %c0_2 = arith.constant 0 : index
    %3 = vector.load %arg1[%c0_1, %c0_2] : memref<4x32xf32, #tpu.memory_space<vmem>>, vector<4x32xf32>
    %c0_3 = arith.constant 0 : index
    %c0_4 = arith.constant 0 : index
    %4 = vector.load %arg2[%c0_3, %c0_4] : memref<32x16xf32, #tpu.memory_space<vmem>>, vector<32x16xf32>
    %cst = arith.constant dense<0.000000e+00> : vector<4x16xf32>
    %5 = tpu.matmul %3, %4, %cst {dimension_numbers = #tpu.dot_dimension_numbers<[1], [0], [0], [1], [0, 0, 1, 1], [], []>} : vector<4x32xf32>, vector<32x16xf32>, vector<4x16xf32> -> vector<4x16xf32>
    %6 = vector.broadcast %1 : vector<1x16xf32> to vector<4x16xf32>
    %7 = arith.addf %5, %6 : vector<4x16xf32>
    %8 = math.tanh %7 : vector<4x16xf32>
    %c0_5 = arith.constant 0 : index
    %c0_6 = arith.constant 0 : index
    %9 = vector.load %arg3[%c0_5, %c0_6] : memref<16x24xf32, #tpu.memory_space<vmem>>, vector<16x24xf32>
    %cst_7 = arith.constant dense<0.000000e+00> : vector<4x24xf32>
    %10 = tpu.matmul %8, %9, %cst_7 {dimension_numbers = #tpu.dot_dimension_numbers<[1], [0], [0], [1], [0, 0, 1, 1], [], []>} : vector<4x16xf32>, vector<16x24xf32>, vector<4x24xf32> -> vector<4x24xf32>
    %11 = vector.broadcast %2 : vector<1x24xf32> to vector<4x24xf32>
    %12 = arith.addf %10, %11 : vector<4x24xf32>
    %13 = math.tanh %12 : vector<4x24xf32>
    %c0_8 = arith.constant 0 : index
    %c0_9 = arith.constant 0 : index
    %14 = vector.load %arg5[%c0_8, %c0_9] : memref<4x24xf32, #tpu.memory_space<vmem>>, vector<4x24xf32>
    tpu.vector_store %arg5[%c0_8, %c0_9], %13 {strides = array<i32>} : memref<4x24xf32, #tpu.memory_space<vmem>>, vector<4x24xf32>,
    return
  }
  func.func @transform_0(%arg0: i32) -> (i32, i32) {
    %c0_i32 = arith.constant 0 : i32
    %c0_i32_0 = arith.constant 0 : i32
    return %arg0, %c0_i32 : i32, i32
  }
  func.func @transform_1(%arg0: i32) -> (i32, i32) {
    %c0_i32 = arith.constant 0 : i32
    %c0_i32_0 = arith.constant 0 : i32
    %c0_i32_1 = arith.constant 0 : i32
    return %c0_i32, %c0_i32_0 : i32, i32
  }
  func.func @transform_2(%arg0: i32) -> (i32, i32) {
    %c0_i32 = arith.constant 0 : i32
    %c0_i32_0 = arith.constant 0 : i32
    %c0_i32_1 = arith.constant 0 : i32
    return %c0_i32, %c0_i32_0 : i32, i32
  }
  func.func @transform_3(%arg0: i32) -> (i32, i32) {
    %c0_i32 = arith.constant 0 : i32
    %c0_i32_0 = arith.constant 0 : i32
    %c0_i32_1 = arith.constant 0 : i32
    return %c0_i32, %c0_i32_0 : i32, i32
  }
  func.func @transform_4(%arg0: i32) -> (i32, i32) {
    %c0_i32 = arith.constant 0 : i32
    %c0_i32_0 = arith.constant 0 : i32
    return %arg0, %c0_i32 : i32, i32
  }
}

</mosaic_0001>

<bundles_post_ra>
// kernel: dnn_forward.1
= control target key start
LH: loop header
LB: loop body
LE: loop exit
PB: predicated region body
PF: predicated region fallthrough
CT: control target
= control target key end

     0   :  { %v269_v3 = vmov 0.0|0.0   ;;  %vm270_vm0 = vmmov 0   ;;  %v271_v6 = vmov 0.0   ;;  %s334_s0 = inlined_call_operand.vmem [shape: f32[4,32], index: 0, kind: input, shape index: {}]   ;;  %s335_s1 = inlined_call_operand.vmem [shape: f32[32,16], index: 1, kind: input, shape index: {}]   ;;  %s336_s2 = inlined_call_operand.vmem [shape: f32[16,24], index: 2, kind: input, shape index: {}]   ;;  %s337_s3 = inlined_call_operand.vmem [shape: f32[2,24], index: 3, kind: input, shape index: {}]   ;;  %s338_s4 = inlined_call_operand.hbm [shape: f32[4,24], index: 4, kind: output, shape index: {}]  }
   0x1   :  { %v20_v0 = vld [vmem:[%s335_s1] sm:$0xff]  ;;  %v21_v1 = vld [vmem:[%s335_s1 + $0x8] sm:$0xff]  ;;  %v22_v2 = vld [vmem:[%s335_s1 + $0x10] sm:$0xff]  ;;  %228 = vmatprep.subr.bf16.mxu0 %v269_v3  ;;  %218 = vmatprep.mubr.msk.f32.mxu0 %vm270_vm0, %v271_v6 }
   0x2   :  { %v229_v4 = vpack.c.bf16 %v21_v1, %v20_v0  ;;  %v23_v5 = vld [vmem:[%s335_s1 + $0x18] sm:$0xff]  ;;  %234 = vmatprep.subr.bf16.mxu1 %v269_v3  ;;  %225 = vmatprep.mubr.msk.f32.mxu1 %vm270_vm0, %v271_v6 }
   0x3   :  { %9 = vsyncpa [#allocation3], 0  ;;  %v232_v7 = vpack.c.bf16 %v23_v5, %v22_v2  ;;  %v19_v8 = vld [vmem:[%s334_s0] sm:$0xf]  ;;  %vm28_vm1 = vcmask 261120   ;;  %v104_v10 = vld [vmem:[%s336_s2 + $0x8] sm:$0xff]  ;;  %v24_v12 = vlaneseq }
   0x4   :  { %230 = vmatpush3.bf16.msra.mxu0 %v229_v4  ;;  %v103_v9 = vld [vmem:[%s336_s2] sm:$0xff]  ;;  %vm109_vm2 = vcmask 130048   ;;  %s272_s0 = smov [#allocation2]   ;;  %vm184_vm3 = vcmask 191488  }
   0x5   :  { %231 = vmatprep.subr.bf16.mxu0 %v269_v3  ;;  %v235_v11 = vpack.c.bf16 %v104_v10, %v103_v9  ;;  %v25_v13 = vshrl.u32 %v24_v12, 7  ;;  %v18_v15 = vld [vmem:[%s337_s3] sm:$0x3]  ;;  %s192_s2 = sshll.u32 %s272_s0, 4  ;;  %s193_s2 = int_to_ptr.vmem [resolvable:$true] %s192_s2 }
   0x6   :  { %s245_s3 = scalar_lea.vmem %s193_s2, 64  ;;  %p250_p1 = scmp.lt.s32.totalorder %s193_s2, %s193_s2 }
   0x7   :  { %236 = vmatpush3.bf16.msra.mxu1 %v235_v11  ;;  %v26_v14 = vsub.s32 0, %v25_v13  ;;  %v107_v21 = vsub.s32 1, %v25_v13  ;;  %p246_p0 = scmp.ne.s32.totalorder %s193_s2, %s245_s3  ;;  %p251_p2 = scmp.lt.s32.totalorder %s245_s3, %s245_s3 }
   0x8   :  { %233 = vmatpush3.bf16.msra.mxu0 %v232_v7 }
   0x9   :  { %v27_v16 = vrot.slane %v18_v15, %v26_v14  ;;  %v108_v22 = vrot.slane %v18_v15, %v107_v21  ;;  %p252_p3 = por %p251_p2, %p250_p1 }
   0xb   :  { %219 = vmatmul.mubr.msk.f32.vlgmr.msra.gmra.mrb[0].mxu0 %vm28_vm1, %v19_v8  ;;  %p253_p4 = pnand %p252_p3, %p246_p0 }
  0xde   :  { %v98_v17 = vpop.f32.mrb[0].mxu0 }
  0xdf   :  { %v99_v18 = vadd.f32 %v98_v17, %v27_v16  ;;  %v220_v19 = vpop.f32.mrb[1].mxu0 }
  0xe1   :  { %241 = vtanh.f32 %v99_v18 }
  0xeb   :  { %v242_v20 = vpop.eup %241 }
  0xec   :  { %226 = vmatmul.mubr.msk.f32.vlgmr.msra.gmra.mrb[0].mxu1 %vm109_vm2, %v242_v20 }
 0x1bf   :  { %v179_v23 = vpop.f32.mrb[0].mxu1 }
 0x1c0   :  { %v180_v24 = vadd.f32 %v179_v23, %v108_v22  ;;  %v227_v25 = vpop.f32.mrb[1].mxu1 }
 0x1c2   :  { %243 = vtanh.f32 %v180_v24 }
 0x1cc   :  { %v244_v26 = vpop.eup %243 }
 0x1cd   :  { %185 = vst.msk [vmem:[#allocation2] sm:$0xf] %vm184_vm3, %v244_v26 }
 0x1ce   :  { %256 = shalt.err (!%p253_p4)
}
 0x1cf   :  { %s257_s6 = scalar_lea.hbm %s338_s4, 64 }
 0x1d0   :  { %p258_p5 = scmp.ne.s32.totalorder %s338_s4, %s257_s6  ;;  %p261_p6 = scmp.lt.u32.totalorder %s257_s6, %s338_s4 }
 0x1d2   :  { %p263_p7 = pnand %p261_p6, %p258_p5 }
 0x1d4   :  { %266 = shalt.err (!%p263_p7)
}
 0x1d5   :  { %195 = dma.vmem_to_hbm [thread:$0]  %s193_s2, 64, %s338_s4, [#allocation3]  }
 0x1d6   :  { %267 = dma.done.wait [#allocation3], 64  }
 0x1d7   :  { %268 = vsyncadd [#allocation3], 4294967232 }
 0x1d8   :  { %199 = vsyncpa [#allocation3], 1 }

</bundles_post_ra>
